<compile_context>
chip_gen: v7x
topology: tpu7x:2x2x1
jax: 0.10.0
libtpu: 0.0.40
codegen_flags: <defaults>
</compile_context>

<pallas_src>
import jax
import jax.numpy as jnp
from jax import lax
from jax.experimental import pallas as pl
from jax.experimental.pallas import tpu as pltpu


def _round_up(x: int, m: int) -> int:
    return ((x + m - 1) // m) * m


def _logreg_kernel(x_ref, w_ref, b_ref, o_ref):
    # x_ref: (TB, D) VMEM tile, w_ref: (1, D) VMEM (resident), b_ref: (1, 1) SMEM,
    # o_ref: (1, TB) VMEM (lane-dense output row).
    x = x_ref[...].astype(jnp.float32)          # (TB, D)
    w = w_ref[...].astype(jnp.float32)          # (1, D)
    b = b_ref[0, 0]                             # scalar from SMEM

    # Contract over D: (1, D) . (TB, D) -> (1, TB). Output row is lane-dense.
    logits = lax.dot_general(
        w, x,
        dimension_numbers=(((1,), (1,)), ((), ())),
        preferred_element_type=jnp.float32,
    ) + b                                       # (1, TB)

    o_ref[...] = jax.nn.sigmoid(logits).astype(o_ref.dtype)


def logistic_regression(x, weight, bias, *, block_rows: int = 512):
    """x: [B, D] float32, weight: [1, D], bias: [1] -> [B, 1] float32.

    block_rows: batch-tile size. 512 rows keeps 2 (double-buffer) x TB x D x 4B
    well within the scoped-VMEM default on v5e/v6e/v7x for typical D; sweep
    {512, 1024, 2048} on v6e if D is small and B is huge.
    """
    B, D = x.shape

    # Tile size: multiple of 128 so the lane-dense (1, TB) output block is
    # unmasked-store friendly; pad the batch up to a multiple of TB.
    TB = _round_up(min(block_rows, _round_up(B, 128)), 128)
    B_pad = _round_up(B, TB)
    if B_pad != B:
        x = jnp.pad(x, ((0, B_pad - B), (0, 0)))
    num_tiles = B_pad // TB

    x = x.astype(jnp.float32)
    w2 = weight.astype(jnp.float32).reshape(1, D)
    b2 = bias.astype(jnp.float32).reshape(1, 1)

    cost = pl.CostEstimate(
        flops=2 * B_pad * D + B_pad,
        transcendentals=B_pad,
        bytes_accessed=B_pad * D * 4 + D * 4 + 4 + B_pad * 4,
    )

    out = pl.pallas_call(
        _logreg_kernel,
        out_shape=jax.ShapeDtypeStruct((1, B_pad), jnp.float32),
        grid=(num_tiles,),
        in_specs=[
            # x: one (TB, D) row-tile per grid step (pipelined/double-buffered).
            pl.BlockSpec((TB, D), lambda i: (i, 0)),
            # weight: constant index_map -> fetched once, stays resident in VMEM.
            pl.BlockSpec((1, D), lambda i: (0, 0)),
            # bias: scalar in SMEM (no padded VMEM tile, no vld slot).
            pl.BlockSpec((1, 1), lambda i: (0, 0),
                         memory_space=pltpu.MemorySpace.SMEM),
        ],
        # Lane-dense output: each grid step writes a full-width (1, TB) row slab.
        out_specs=pl.BlockSpec((1, TB), lambda i: (0, i)),
        compiler_params=pltpu.CompilerParams(
            dimension_semantics=("parallel",),
        ),
        cost_estimate=cost,
    )(x, w2, b2)

    # Free layout plumbing back to the PyTorch (B, 1) shape; drop padded rows.
    return out.reshape(B_pad, 1)[:B]


if __name__ == "__main__":
    key = jax.random.PRNGKey(0)
    kx, kw, kb = jax.random.split(key, 3)

    batch = 8
    input_dim = 32

    x = jax.random.normal(kx, (batch, input_dim), dtype=jnp.float32)
    # Deterministic parameter init (mimics shapes of torch.nn.Linear(input_dim, 1)).
    bound = 1.0 / jnp.sqrt(input_dim)
    weight = jax.random.uniform(kw, (1, input_dim), jnp.float32, -bound, bound)
    bias = jax.random.uniform(kb, (1,), jnp.float32, -bound, bound)

    y = logistic_regression(x, weight, bias)
    jax.block_until_ready(y)

    # Pure-JAX reference check.
    y_ref = jax.nn.sigmoid(x @ weight.T + bias)
    assert y.shape == (batch, 1)
    assert jnp.allclose(y, y_ref, atol=1e-5, rtol=1e-5)

    print("KERNEL_OK")
</pallas_src>

<mosaic_0001>
module attributes {stable_mosaic.version = 11 : i64} {
  func.func @_logreg_kernel(%arg0: i32, %arg1: memref<128x32xf32, #tpu.memory_space<vmem>>, %arg2: memref<1x32xf32, #tpu.memory_space<vmem>>, %arg3: memref<1x1xf32, #tpu.memory_space<smem>>, %arg4: memref<1x128xf32, #tpu.memory_space<vmem>>) attributes {dimension_semantics = [#tpu.dimension_semantics<parallel>], iteration_bounds = array<i64: 1>, scalar_prefetch = 0 : i64, scratch_operands = 0 : i64, tpu.core_type = #tpu.core_type<tc>, window_params = [{transform_indices = @transform_0, window_bounds = array<i64: 128, 32>}, {pipeline_mode = #tpu.pipeline_mode<synchronous>, transform_indices = @transform_1, window_bounds = array<i64: 1, 32>}, {transform_indices = @transform_2, window_bounds = array<i64: 1, 1>}, {transform_indices = @transform_3, window_bounds = array<i64: 1, 128>}]} {
    %c0 = arith.constant 0 : index
    %c0_0 = arith.constant 0 : index
    %0 = vector.load %arg1[%c0, %c0_0] : memref<128x32xf32, #tpu.memory_space<vmem>>, vector<128x32xf32>
    %c0_1 = arith.constant 0 : index
    %c0_2 = arith.constant 0 : index
    %1 = vector.load %arg2[%c0_1, %c0_2] : memref<1x32xf32, #tpu.memory_space<vmem>>, vector<1x32xf32>
    %c0_3 = arith.constant 0 : index
    %c0_4 = arith.constant 0 : index
    %2 = memref.load %arg3[%c0_3, %c0_4] : memref<1x1xf32, #tpu.memory_space<smem>>
    %cst = arith.constant dense<0.000000e+00> : vector<1x128xf32>
    %3 = tpu.matmul %1, %0, %cst {dimension_numbers = #tpu.dot_dimension_numbers<[1], [1], [0], [0], [0, 0, 1, 0], [], []>} : vector<1x32xf32>, vector<128x32xf32>, vector<1x128xf32> -> vector<1x128xf32>
    %4 = vector.broadcast %2 : f32 to vector<1x128xf32>
    %5 = arith.addf %3, %4 : vector<1x128xf32>
    %6 = arith.negf %5 : vector<1x128xf32>
    %7 = math.exp %6 : vector<1x128xf32>
    %cst_5 = arith.constant 1.000000e+00 : f32
    %8 = vector.broadcast %cst_5 : f32 to vector<1x128xf32>
    %9 = arith.addf %8, %7 : vector<1x128xf32>
    %10 = arith.divf %8, %9 : vector<1x128xf32>
    %c0_6 = arith.constant 0 : index
    %c0_7 = arith.constant 0 : index
    %11 = vector.load %arg4[%c0_6, %c0_7] : memref<1x128xf32, #tpu.memory_space<vmem>>, vector<1x128xf32>
    tpu.vector_store %arg4[%c0_6, %c0_7], %10 {strides = array<i32>} : memref<1x128xf32, #tpu.memory_space<vmem>>, vector<1x128xf32>,
    return
  }
  func.func @transform_0(%arg0: i32) -> (i32, i32) {
    %c0_i32 = arith.constant 0 : i32
    %c0_i32_0 = arith.constant 0 : i32
    return %arg0, %c0_i32 : i32, i32
  }
  func.func @transform_1(%arg0: i32) -> (i32, i32) {
    %c0_i32 = arith.constant 0 : i32
    %c0_i32_0 = arith.constant 0 : i32
    %c0_i32_1 = arith.constant 0 : i32
    return %c0_i32, %c0_i32_0 : i32, i32
  }
  func.func @transform_2(%arg0: i32) -> (i32, i32) {
    %c0_i32 = arith.constant 0 : i32
    %c0_i32_0 = arith.constant 0 : i32
    %c0_i32_1 = arith.constant 0 : i32
    return %c0_i32, %c0_i32_0 : i32, i32
  }
  func.func @transform_3(%arg0: i32) -> (i32, i32) {
    %c0_i32 = arith.constant 0 : i32
    %c0_i32_0 = arith.constant 0 : i32
    return %c0_i32, %arg0 : i32, i32
  }
}

</mosaic_0001>

<bundles_post_ra>
// kernel: tpu_custom_call.1
= control target key start
LH: loop header
LB: loop body
LE: loop exit
PB: predicated region body
PF: predicated region fallthrough
CT: control target
= control target key end

     0   :  { %vm35_vm0 = vcmask 261120   ;;  %v312_v2 = vmov 0.0|0.0   ;;  %vm313_vm2 = vmmov 0   ;;  %v314_v5 = vmov 0.0   ;;  %s425_s0 = inlined_call_operand.vmem [shape: f32[128,32], index: 0, kind: input, shape index: {}]   ;;  %s426_s1 = inlined_call_operand.vmem [shape: f32[1,32], index: 1, kind: input, shape index: {}]   ;;  %s427_s2 = inlined_call_operand.<no memory space> [shape: f32[1,1], index: 2, kind: input, shape index: {}]   ;;  %s428_s3 = inlined_call_operand.hbm [shape: f32[1,128], index: 3, kind: output, shape index: {}]  }
   0x1   :  { %v16_v0 = vld [vmem:[%s425_s0] sm:$0xff]  ;;  %v17_v1 = vld [vmem:[%s425_s0 + $0x8] sm:$0xff]  ;;  %248 = vmatprep.subr.bf16.mxu0 %v312_v2  ;;  %vm344_vm1 = vmpackc.low %vm35_vm0, %vm35_vm0  ;;  %245 = vmatprep.mubr.msk.f32.mxu0 %vm313_vm2, %v314_v5 }
   0x2   :  { %v249_v3 = vpack.c.bf16 %v17_v1, %v16_v0  ;;  %v18_v6 = vld [vmem:[%s425_s0 + $0x10] sm:$0xff]  ;;  %v19_v7 = vld [vmem:[%s425_s0 + $0x18] sm:$0xff] }
   0x4   :  { %251 = vmatpush3.bf16.xpose.msk.msra.mxu0 %vm344_vm1, %v249_v3 }
   0x5   :  { %252 = vmatprep.subr.bf16.mxu0 %v312_v2 }
   0x6   :  { %9 = vsyncpa [#allocation4], 0  ;;  %v253_v8 = vpack.c.bf16 %v19_v7, %v18_v6  ;;  %v20_v9 = vld [vmem:[%s425_s0 + $0x20] sm:$0xff]  ;;  %v21_v10 = vld [vmem:[%s425_s0 + $0x28] sm:$0xff]  ;;  %v34_v28 = vstv %s427_s2 }
   0x7   :  { %v257_v11 = vpack.c.bf16 %v21_v10, %v20_v9  ;;  %v22_v12 = vld [vmem:[%s425_s0 + $0x30] sm:$0xff]  ;;  %v23_v13 = vld [vmem:[%s425_s0 + $0x38] sm:$0xff]  ;;  %v24_v15 = vld [vmem:[%s425_s0 + $0x40] sm:$0xff] }
   0x8   :  { %v261_v14 = vpack.c.bf16 %v23_v13, %v22_v12  ;;  %v25_v16 = vld [vmem:[%s425_s0 + $0x48] sm:$0xff]  ;;  %v26_v18 = vld [vmem:[%s425_s0 + $0x50] sm:$0xff]  ;;  %v27_v19 = vld [vmem:[%s425_s0 + $0x58] sm:$0xff] }
   0x9   :  { %v265_v17 = vpack.c.bf16 %v25_v16, %v24_v15  ;;  %v269_v20 = vpack.c.bf16 %v27_v19, %v26_v18  ;;  %v28_v21 = vld [vmem:[%s425_s0 + $0x60] sm:$0xff]  ;;  %v29_v22 = vld [vmem:[%s425_s0 + $0x68] sm:$0xff]  ;;  %v30_v24 = vld [vmem:[%s425_s0 + $0x70] sm:$0xff] }
   0xa   :  { %v273_v23 = vpack.c.bf16 %v29_v22, %v28_v21  ;;  %v31_v25 = vld [vmem:[%s425_s0 + $0x78] sm:$0xff]  ;;  %v32_v27 = vld [vmem:[%s426_s1] sm:$0x1]  ;;  %s315_s0 = smov [#allocation3]  }
   0xb   :  { %v277_v26 = vpack.c.bf16 %v31_v25, %v30_v24  ;;  %s170_s21 = sshll.u32 %s315_s0, 4  ;;  %s171_s21 = int_to_ptr.vmem [resolvable:$true] %s170_s21 }
   0xc   :  { %255 = vmatpush3.bf16.xpose.msk.msra.mxu0 %vm344_vm1, %v253_v8  ;;  %s288_s1 = scalar_lea.vmem %s171_s21, 16  ;;  %s292_s22 = scalar_lea.vmem %s171_s21, 32 }
   0xd   :  { %256 = vmatprep.subr.bf16.mxu0 %v312_v2  ;;  %p289_p0 = scmp.ne.s32.totalorder %s171_s21, %s288_s1  ;;  %p293_p1 = scmp.lt.s32.totalorder %s171_s21, %s171_s21 }
   0xe   :  { %p294_p2 = scmp.lt.s32.totalorder %s292_s22, %s288_s1 }
  0x10   :  { %p295_p3 = por %p294_p2, %p293_p1 }
  0x12   :  { %p296_p4 = pnand %p295_p3, %p289_p0 }
  0x14   :  { %259 = vmatpush3.bf16.xpose.msk.msra.mxu0 %vm344_vm1, %v257_v11 }
  0x15   :  { %260 = vmatprep.subr.bf16.mxu0 %v312_v2 }
  0x1c   :  { %263 = vmatpush3.bf16.xpose.msk.msra.mxu0 %vm344_vm1, %v261_v14 }
  0x1d   :  { %264 = vmatprep.subr.bf16.mxu0 %v312_v2 }
  0x24   :  { %267 = vmatpush3.bf16.xpose.msk.msra.mxu0 %vm344_vm1, %v265_v17 }
  0x25   :  { %268 = vmatprep.subr.bf16.mxu0 %v312_v2 }
  0x2c   :  { %271 = vmatpush3.bf16.xpose.msk.msra.mxu0 %vm344_vm1, %v269_v20 }
  0x2d   :  { %272 = vmatprep.subr.bf16.mxu0 %v312_v2 }
  0x34   :  { %275 = vmatpush3.bf16.xpose.msk.msra.mxu0 %vm344_vm1, %v273_v23 }
  0x35   :  { %276 = vmatprep.subr.bf16.mxu0 %v312_v2 }
  0x3c   :  { %279 = vmatpush3.bf16.xpose.msk.msra.mxu0 %vm344_vm1, %v277_v26 }
  0x43   :  { %246 = vmatmul.mubr.msk.f32.vlgmr.msra.gmra.mrb[0].mxu0 %vm35_vm0, %v32_v27 }
 0x116   :  { %v153_v29 = vpop.f32.mrb[0].mxu0 }
 0x117   :  { %v154_v30 = vadd.f32 %v153_v29, %v34_v28  ;;  %v247_v31 = vpop.f32.mrb[1].mxu0 }
 0x119   :  { %v195_v32 = vmul.f32 -1.442695, %v154_v30 }
 0x11b   :  { %284 = vpow2.f32 %v195_v32 }
 0x125   :  { %v285_v33 = vpop.eup %284 }
 0x126   :  { %v160_v34 = vadd.f32 1.0, %v285_v33 }
 0x128   :  { %286 = vrcp.f32 %v160_v34 }
 0x132   :  { %v287_v35 = vpop.eup %286 }
 0x133   :  { %163 = vst [vmem:[#allocation3] sm:$0x1] %v287_v35 }
 0x134   :  { %299 = shalt.err (!%p296_p4)
}
 0x135   :  { %s300_s24 = scalar_lea.hbm %s428_s3, 16 }
 0x136   :  { %p301_p5 = scmp.ne.s32.totalorder %s428_s3, %s300_s24  ;;  %p304_p6 = scmp.lt.u32.totalorder %s300_s24, %s428_s3 }
 0x138   :  { %p306_p7 = pnand %p304_p6, %p301_p5 }
 0x13a   :  { %309 = shalt.err (!%p306_p7)
}
 0x13b   :  { %173 = dma.vmem_to_hbm [thread:$0]  %s171_s21, 16, %s428_s3, [#allocation4]  }
 0x13c   :  { %310 = dma.done.wait [#allocation4], 16  }
 0x13d   :  { %311 = vsyncadd [#allocation4], 4294967280 }
 0x13e   :  { %177 = vsyncpa [#allocation4], 1 }

</bundles_post_ra>
